<compile_context>
chip_gen: v5e
topology: v5e:2x2
jax: 0.10.0
libtpu: 0.0.40
codegen_flags: <defaults>
</compile_context>

<pallas_src>
import math

import jax
import jax.numpy as jnp
from jax.experimental import pallas as pl
from jax.experimental.pallas import tpu as pltpu


def _round_up(a, b):
    return (a + b - 1) // b * b


# ----------------------------- Pallas kernel ------------------------------- #
def _fused_patch_conv_kernel(x_ref, w_ref, o_ref):
    # x_ref: (TM, 3P) bf16 -- row = [patch(t-1) | patch(t) | patch(t+1)]
    # w_ref: (3P, D)  bf16 -- conv taps stacked along K
    # o_ref: (TM, D)  bf16 -- f32 accumulation on the MXU, cast on store
    o_ref[...] = jnp.dot(
        x_ref[...], w_ref[...], preferred_element_type=jnp.float32
    ).astype(o_ref.dtype)


def fused_patch_conv(x3, w_fused, *, row_tile=2048, vmem_budget=12 * 1024 * 1024):
    """x3: (M, 3P) bf16; w_fused: (3P, D) bf16 -> (M, D) bf16."""
    M, K3 = x3.shape
    D = w_fused.shape[-1]

    # >= 4 grid steps when M permits: on v7x ("parallel" grid sharded across
    # 2 TensorCores) each core then has >= 2 steps, so BlockSpec
    # double-buffering actually overlaps DMA with compute.
    tm_steps = _round_up(pl.cdiv(M, 4), 16)

    # VMEM cap: 2 double-buffered IO tiles (bf16 LHS + bf16 out) plus the
    # resident weights (conservatively counted twice).  12 MiB keeps us under
    # v5e's 16 MiB scoped default; v6e/v7x (32 MiB) have even more headroom.
    avail = vmem_budget - 2 * K3 * D * w_fused.dtype.itemsize
    bytes_per_row = 2 * (K3 * x3.dtype.itemsize + D * 2)
    tm_budget = max(16, (avail // bytes_per_row) // 16 * 16)

    # Multiple of 16: bf16 sublane packing for both the LHS and the bf16 out.
    TM = max(16, min(row_tile, tm_steps, tm_budget))

    return pl.pallas_call(
        _fused_patch_conv_kernel,
        out_shape=jax.ShapeDtypeStruct((M, D), jnp.bfloat16),
        grid_spec=pltpu.PrefetchScalarGridSpec(
            num_scalar_prefetch=0,
            grid=(pl.cdiv(M, TM),),          # ragged last tile is fine: rows are independent
            in_specs=[
                pl.BlockSpec((TM, K3), lambda i: (i, 0)),   # row tile
                pl.BlockSpec((K3, D), lambda i: (0, 0)),    # weights, resident
            ],
            out_specs=pl.BlockSpec((TM, D), lambda i: (i, 0)),
        ),
        compiler_params=pltpu.CompilerParams(
            dimension_semantics=("parallel",),
        ),
    )(x3, w_fused)


# ------------------------------ Module glue -------------------------------- #
def init_patch_embedding_params(key, d_model, patch_len):
    """Conv1d weight (d_model, patch_len, 3), kaiming_normal_(fan_in, leaky_relu)."""
    fan_in = patch_len * 3
    gain = math.sqrt(2.0)  # PyTorch kaiming_normal_ leaky_relu default a=0
    std = gain / math.sqrt(fan_in)
    w = jax.random.normal(key, (d_model, patch_len, 3), dtype=jnp.float32) * std
    return {"conv_weight": w}


def patch_embedding2_forward(params, x, patch_len, stride):
    """x: (B, n_vars, L) -> ((B*n_vars, T, d_model) bf16, n_vars)."""
    B, n_vars, L = x.shape
    w = params["conv_weight"]                       # (D, P, 3)
    D = w.shape[0]
    P = patch_len

    # Cast to the MXU operand dtype up front so every wrapper copy below
    # (pad / unfold / roll / concat) moves bf16, not f32.
    xb = x.astype(jnp.bfloat16)

    # ReplicationPad1d((0, stride)): repeat last timestep `stride` times.
    x_pad = jnp.concatenate(
        [xb, jnp.repeat(xb[:, :, -1:], stride, axis=-1)], axis=-1
    )                                               # (B, n_vars, L + stride)

    # Number of patches from unfold(dim=-1, size=patch_len, step=stride).
    T = (L + stride - patch_len) // stride + 1

    # unfold via P static strided slices (near-roofline copies; no generic
    # XLA gather).
    last = (T - 1) * stride
    patches = jnp.stack(
        [x_pad[:, :, p:last + p + 1:stride] for p in range(P)], axis=-1
    )                                               # (B, n_vars, T, P)

    # Circular k=3 taps fused along K:
    #   row (b, v, t) = [patch((t-1) % T) | patch(t) | patch((t+1) % T)]
    # Rolls on the T axis lower to static slices + concat.
    prev = jnp.roll(patches, 1, axis=2)
    nxt = jnp.roll(patches, -1, axis=2)
    x3 = jnp.concatenate([prev, patches, nxt], axis=-1)   # (B, n_vars, T, 3P)
    M = B * n_vars * T
    x3 = x3.reshape(M, 3 * P)

    # Fused weight: (D, P, 3) -> taps (3, P, D) -> (3P, D).  No D padding:
    # the last dim equals the full array dim (legal block dim), and for this
    # HBM-bound kernel masked stores cost less than padded writes + a slice.
    w_fused = jnp.transpose(w, (2, 1, 0)).reshape(3 * P, D).astype(jnp.bfloat16)

    out = fused_patch_conv(x3, w_fused)             # (M, D) bf16
    out = out.reshape(B * n_vars, T, D)             # metadata-only reshape

    # TODO(synk): dropout is identity at inference (no RNG applied).
    return out, n_vars


# Pure-JAX reference (same math, tap-wise, no Pallas).  Inputs are pre-rounded
# to bf16 so it matches the kernel's operand precision; accumulation in f32.
# The kernel additionally rounds its output to bf16, hence the tolerance.
def _reference(params, x, patch_len, stride):
    B, n_vars, L = x.shape
    xb = x.astype(jnp.bfloat16).astype(jnp.float32)
    pad = jnp.repeat(xb[:, :, -1:], stride, axis=-1)
    xr = jnp.concatenate([xb, pad], axis=-1)
    T = (L + stride - patch_len) // stride + 1
    idx = jnp.arange(T)[:, None] * stride + jnp.arange(patch_len)[None, :]
    xr = xr[:, :, idx].reshape(B * n_vars, T, patch_len)
    xp = jnp.concatenate([xr[:, -1:, :], xr, xr[:, :1, :]], axis=1)
    w = jnp.transpose(params["conv_weight"], (2, 1, 0))
    w = w.astype(jnp.bfloat16).astype(jnp.float32)                # (3, P, D)
    out = (jnp.einsum("btp,pd->btd", xp[:, 0:T], w[0])
           + jnp.einsum("btp,pd->btd", xp[:, 1:T + 1], w[1])
           + jnp.einsum("btp,pd->btd", xp[:, 2:T + 2], w[2]))
    return out


if __name__ == "__main__":
    key = jax.random.PRNGKey(0)

    def run_check(B, n_vars, L, d_model, patch_len, stride, seed_offset):
        k_w, k_x = jax.random.split(jax.random.fold_in(key, seed_offset))
        params = init_patch_embedding_params(k_w, d_model, patch_len)
        x = jax.random.normal(k_x, (B, n_vars, L), dtype=jnp.float32)

        out, nv = patch_embedding2_forward(params, x, patch_len, stride)
        out = jax.block_until_ready(out)

        T = (L + stride - patch_len) // stride + 1
        assert out.shape == (B * n_vars, T, d_model), out.shape
        assert out.dtype == jnp.bfloat16, out.dtype
        assert nv == n_vars

        ref = _reference(params, x, patch_len, stride)
        diff = jnp.abs(out.astype(jnp.float32) - ref)
        ok = bool(jnp.all(diff <= 5e-2 + 5e-2 * jnp.abs(ref)))
        assert ok, float(jnp.max(diff))

    # Primary small config (B=2, n_vars=4, L=64, d_model=32, P=16, stride=8):
    # M = 64 (divides the 16-row tile), D=32 (true-D masked-store path).
    run_check(B=2, n_vars=4, L=64, d_model=32, patch_len=16, stride=8,
              seed_offset=0)
    # Ragged config: M = 54 (last row tile partial), lane-aligned d_model=128.
    run_check(B=2, n_vars=3, L=37, d_model=128, patch_len=8, stride=4,
              seed_offset=1)

    print("KERNEL_OK")
</pallas_src>

<mosaic_0001>
module attributes {stable_mosaic.version = 11 : i64} {
  func.func @_fused_patch_conv_kernel(%arg0: i32, %arg1: memref<16x48xbf16, #tpu.memory_space<vmem>>, %arg2: memref<48x32xbf16, #tpu.memory_space<vmem>>, %arg3: memref<16x32xbf16, #tpu.memory_space<vmem>>) attributes {dimension_semantics = [#tpu.dimension_semantics<parallel>], iteration_bounds = array<i64: 4>, scalar_prefetch = 0 : i64, scratch_operands = 0 : i64, tpu.core_type = #tpu.core_type<tc>, window_params = [{transform_indices = @transform_0, window_bounds = array<i64: 16, 48>}, {pipeline_mode = #tpu.pipeline_mode<synchronous>, transform_indices = @transform_1, window_bounds = array<i64: 48, 32>}, {transform_indices = @transform_2, window_bounds = array<i64: 16, 32>}]} {
    %c0 = arith.constant 0 : index
    %c0_0 = arith.constant 0 : index
    %0 = vector.load %arg1[%c0, %c0_0] : memref<16x48xbf16, #tpu.memory_space<vmem>>, vector<16x48xbf16>
    %c0_1 = arith.constant 0 : index
    %c0_2 = arith.constant 0 : index
    %1 = vector.load %arg2[%c0_1, %c0_2] : memref<48x32xbf16, #tpu.memory_space<vmem>>, vector<48x32xbf16>
    %cst = arith.constant dense<0.000000e+00> : vector<16x32xf32>
    %2 = tpu.matmul %0, %1, %cst {dimension_numbers = #tpu.dot_dimension_numbers<[1], [0], [0], [1], [0, 0, 1, 1], [], []>} : vector<16x48xbf16>, vector<48x32xbf16>, vector<16x32xf32> -> vector<16x32xf32>
    %3 = arith.truncf %2 : vector<16x32xf32> to vector<16x32xbf16>
    %c0_3 = arith.constant 0 : index
    %c0_4 = arith.constant 0 : index
    %4 = vector.load %arg3[%c0_3, %c0_4] : memref<16x32xbf16, #tpu.memory_space<vmem>>, vector<16x32xbf16>
    tpu.vector_store %arg3[%c0_3, %c0_4], %3 {strides = array<i32>} : memref<16x32xbf16, #tpu.memory_space<vmem>>, vector<16x32xbf16>,
    return
  }
  func.func @transform_0(%arg0: i32) -> (i32, i32) {
    %c0_i32 = arith.constant 0 : i32
    %c0_i32_0 = arith.constant 0 : i32
    return %arg0, %c0_i32 : i32, i32
  }
  func.func @transform_1(%arg0: i32) -> (i32, i32) {
    %c0_i32 = arith.constant 0 : i32
    %c0_i32_0 = arith.constant 0 : i32
    %c0_i32_1 = arith.constant 0 : i32
    return %c0_i32, %c0_i32_0 : i32, i32
  }
  func.func @transform_2(%arg0: i32) -> (i32, i32) {
    %c0_i32 = arith.constant 0 : i32
    %c0_i32_0 = arith.constant 0 : i32
    return %arg0, %c0_i32 : i32, i32
  }
}

</mosaic_0001>

<bundles_post_ra>
// kernel: tpu_custom_call.1
= control target key start
LH: loop header
LB: loop body
LE: loop exit
PB: predicated region body
PF: predicated region fallthrough
CT: control target
= control target key end

     0   :  { %s321_s9 = smov 0   ;;  %s347_s0 = inlined_call_operand.vmem [shape: bf16[64,48], index: 0, kind: input, shape index: {}]   ;;  %s348_s1 = inlined_call_operand.vmem [shape: bf16[48,32], index: 1, kind: input, shape index: {}]   ;;  %s349_s2 = inlined_call_operand.vmem [shape: bf16[64,32], index: 2, kind: output, shape index: {}]  }
   0x1 LB: > { %s258_s10 = sadd.s32 4294967295, %s304_s9   ;;  %p262_p0 = scmp.ge.s32.totalorder %s304_s9, 1  ;;  %s304_s9 = sphi %s321_s9, %s12_s9  }
   0x2   : > { %p113_p1 = scmp.lt.s32.totalorder %s304_s9, 5 }
   0x4   : > { %p114_p2 = pnand %p262_p0, %p113_p1 }
   0x5   : > { %s263_s13 = sshll.u32 (!%p114_p2), %s258_s10, 1 }
   0x6   : > { %117 = sbr.rel (%p114_p2) target bundleno = 160 (0xa0), region = 28  ;;  %p136_p3 = scmp.lt.s32.totalorder (!%p114_p2), %s263_s13, 7 }
   0xb   : > { %v289_v0 = vld [vmem:[%s348_s1 + $0x10] sm:$0xff]  ;;  %v288_v1 = vld [vmem:[%s348_s1 + $0x8] sm:$0xff]  ;;  %s351_s13 = smov (!%p136_p3, %s263_s13), 7  ;;  %v287_v2 = vld [vmem:[%s348_s1] sm:$0xff]  ;;  %vm179_vm0 = vcmask 392192   ;;  %vm199_vm1 = vcmask 257024  }
   0xc   : > { %188 = vmatpush.bf16.msra.mxu0 %v289_v0  ;;  %s264_s16 = sshll.u32 %s351_s13, 2 }
   0xd   : > { %s139_s21 = scalar_lea.vmem %s347_s0, %s264_s16  ;;  %s145_s24 = scalar_lea.vmem %s349_s2, %s264_s16 }
   0xe   : > { %v286_v3 = vld [vmem:[%s139_s21] sm:$0xff] }
  0x10   : > { %189 = vmatpush.bf16.msra.mxu0 %v288_v1 }
  0x14   : > { %190 = vmatpush.bf16.msra.mxu0 %v287_v2 }
  0x17   : > { %283 = vmatmul.msk.bf16.vlgmr.msra.gmra.mxu0 %vm179_vm0, %v286_v3 }
  0x94   : > { %v192_v4 = vpop.f32.mrf.mxu0 }
  0x95   : > { %v197_v5 = vpack.c.bf16 %v192_v4, %v192_v4 }
  0x97   : > { %200 = vst.msk [vmem:[%s145_s24] sm:$0xf] %vm199_vm1, %v197_v5 }
  0x9c   : > { %v194_v6 = vpop.f32.mrf.mxu0 }
  0x9d   : > { %v198_v7 = vpack.c.bf16 %v194_v6, %v194_v6 }
  0x9f   : > { %201 = vst.msk [vmem:[%s145_s24 + $0x4] sm:$0xf] %vm199_vm1, %v198_v7 }
  0xa0 PF: > { %s12_s9 = sadd.s32 1, %s304_s9  }
  0xa1   : > { %p9_p4 = scmp.ge.s32.totalorder %s12_s9, 6  }
  0xa3   :  { %11 = sbr.rel (!%p9_p4) target bundleno = 1 (0x1), region = 58 }

</bundles_post_ra>
